<compile_context>
chip_gen: v7x
topology: tpu7x:2x2x1
jax: 0.10.0
libtpu: 0.0.40
codegen_flags: <defaults>
</compile_context>

<pallas_src>
import functools

import jax
import jax.numpy as jnp
from jax.experimental import pallas as pl
from jax.experimental.pallas import tpu as pltpu

_LANES = 128  # TPU vreg lane width


def _folded_kernel(x_ref, params_ref, w2_ref, out_ref, *, inv_norm, k):
    # x_ref:      [tb, K]      compact folded speeds (P items/row, zero-padded to K)
    # params_ref: [K+2, 128]   rows 0..K-1 = kron(I_P, w1) (zero-padded),
    #                          row K = b1 tiled, row K+1 = b2 tiled
    # w2_ref:     [128, 128]   kron(I_P, w2)  (block-diagonal second Linear)
    # out_ref:    [tb, 128]    lane-dense: P batch items x C channels per row
    x = x_ref[...] * inv_norm                                           # tiny VPU op
    # Linear(1 -> C) + fold-to-lanes broadcast in one MXU matmul.
    h = jnp.dot(x, params_ref[0:k, :], preferred_element_type=jnp.float32)
    h = jnp.maximum(h + params_ref[k:k + 1, :], 0.0)                    # ReLU
    # Linear(C -> C): block-diagonal MXU matmul, f32 accumulation.
    o = jnp.dot(h, w2_ref[...], preferred_element_type=jnp.float32)
    out_ref[...] = jnp.maximum(o + params_ref[k + 1:k + 2, :], 0.0).astype(out_ref.dtype)


def _simple_kernel(x_ref, params_ref, w2_ref, out_ref, *, inv_norm):
    # Fallback (C does not divide 128):
    # x_ref [tb, 1]; params_ref [3, C] (w1, b1, b2); w2_ref [C, C]; out_ref [tb, C]
    x = x_ref[...] * inv_norm
    h = jnp.maximum(x * params_ref[0:1, :] + params_ref[1:2, :], 0.0)   # Linear(1->C)+ReLU
    o = jnp.dot(h, w2_ref[...], preferred_element_type=jnp.float32)
    out_ref[...] = jnp.maximum(o + params_ref[2:3, :], 0.0).astype(out_ref.dtype)


def _pick_row_tile(n_rows):
    # Largest row tile (multiple of 8 sublanes) that still yields >= 2 grid steps,
    # so both v7x TensorCores get work; minimum 8 keeps blocks (8,128)-aligned.
    for tb in (512, 256, 128, 64, 32, 16, 8):
        if n_rows >= 2 * tb:
            return tb
    return 8


def speed_encoder(speed, w1, b1, w2, b2, speed_normalisation):
    """speed: [..., 1] f32; w1, b1, b2: [1, C]; w2: [C, C] ([in, out] layout)."""
    C = w1.shape[1]
    lead = speed.shape[:-1]
    B = 1
    for d in lead:
        B *= d
    speed2d = speed.reshape(B, 1).astype(jnp.float32)
    inv_norm = 1.0 / float(speed_normalisation)

    if C <= _LANES and _LANES % C == 0:
        # ---- folded, lane-dense path (the common case, e.g. C = 32) ----
        P = _LANES // C                               # batch items packed per 128-lane row
        K = -(-P // 8) * 8                            # pad contraction dim to 8 sublanes
        tb = _pick_row_tile(-(-B // P))               # folded-row tile
        Bp = -(-B // (P * tb)) * (P * tb)             # pad batch so folded rows % tb == 0
        if Bp != B:
            speed2d = jnp.pad(speed2d, ((0, Bp - B), (0, 0)))
        R = Bp // P
        x = jnp.pad(speed2d.reshape(R, P), ((0, 0), (0, K - P)))            # [R, K]

        # Packed / folded weights — exact layout plumbing, built via XLA.
        # (In a real model these would be built once at init, not per call.)
        w1k = jnp.pad(jnp.kron(jnp.eye(P, dtype=w1.dtype), w1),
                      ((0, K - P), (0, 0)))                                  # [K, 128]
        params = jnp.concatenate(
            [w1k, jnp.tile(b1, (1, P)), jnp.tile(b2, (1, P))], axis=0)       # [K+2, 128]
        w2k = jnp.kron(jnp.eye(P, dtype=w2.dtype), w2)                       # [128, 128]

        kernel = functools.partial(_folded_kernel, inv_norm=inv_norm, k=K)
        out = pl.pallas_call(
            kernel,
            out_shape=jax.ShapeDtypeStruct((R, _LANES), jnp.float32),
            grid_spec=pltpu.PrefetchScalarGridSpec(
                num_scalar_prefetch=0,
                grid=(R // tb,),
                in_specs=[
                    pl.BlockSpec((tb, K), lambda i: (i, 0)),          # compact speeds
                    pl.BlockSpec((K + 2, _LANES), lambda i: (0, 0)),  # packed w1/b1/b2
                    pl.BlockSpec((_LANES, _LANES), lambda i: (0, 0)), # W2 (VMEM-resident)
                ],
                out_specs=pl.BlockSpec((tb, _LANES), lambda i: (i, 0)),
            ),
            compiler_params=pltpu.CompilerParams(
                dimension_semantics=("parallel",)),
        )(x, params, w2k)
        out = out.reshape(Bp, C)[:B]
    else:
        # ---- fallback: C does not fold evenly into 128 lanes ----
        tb = _pick_row_tile(B)
        Bp = -(-B // tb) * tb
        if Bp != B:
            speed2d = jnp.pad(speed2d, ((0, Bp - B), (0, 0)))
        params = jnp.concatenate([w1, b1, b2], axis=0)                       # [3, C]
        kernel = functools.partial(_simple_kernel, inv_norm=inv_norm)
        out = pl.pallas_call(
            kernel,
            out_shape=jax.ShapeDtypeStruct((Bp, C), jnp.float32),
            grid_spec=pltpu.PrefetchScalarGridSpec(
                num_scalar_prefetch=0,
                grid=(Bp // tb,),
                in_specs=[
                    pl.BlockSpec((tb, 1), lambda i: (i, 0)),
                    pl.BlockSpec((3, C), lambda i: (0, 0)),
                    pl.BlockSpec((C, C), lambda i: (0, 0)),
                ],
                out_specs=pl.BlockSpec((tb, C), lambda i: (i, 0)),
            ),
            compiler_params=pltpu.CompilerParams(
                dimension_semantics=("parallel",)),
        )(speed2d, params, w2)
        out = out[:B]

    return out.reshape(*lead, C)


def reference(speed, w1, b1, w2, b2, speed_normalisation):
    x = speed / speed_normalisation
    h = jnp.maximum(x @ w1 + b1, 0.0)
    return jnp.maximum(h @ w2 + b2, 0.0)


if __name__ == "__main__":
    C = 32                     # out_channels
    SPEED_NORM = 5.0           # speed_normalisation

    key = jax.random.PRNGKey(0)
    k_s, k_w1, k_b1, k_w2, k_b2, k_s2 = jax.random.split(key, 6)

    # Deterministic synthetic parameters (shapes of nn.Linear(1,C), nn.Linear(C,C)).
    w1 = jax.random.normal(k_w1, (1, C), jnp.float32) * 0.5
    b1 = jax.random.normal(k_b1, (1, C), jnp.float32) * 0.1
    w2 = jax.random.normal(k_w2, (C, C), jnp.float32) * (1.0 / float(C) ** 0.5)
    b2 = jax.random.normal(k_b2, (1, C), jnp.float32) * 0.1

    # Small batch (single grid step).
    B = 8
    speed = jax.random.uniform(k_s, (B, 1), jnp.float32, minval=-3.0, maxval=3.0)
    out = jax.block_until_ready(speed_encoder(speed, w1, b1, w2, b2, SPEED_NORM))
    ref = reference(speed, w1, b1, w2, b2, SPEED_NORM)
    assert out.shape == (B, C)
    assert jnp.allclose(out, ref, atol=1e-5, rtol=1e-5), "mismatch vs reference (B=8)"

    # Larger batch exercising the 1-D 'parallel' grid with weight-resident blocks.
    B2 = 1024
    speed2 = jax.random.uniform(k_s2, (B2, 1), jnp.float32, minval=-3.0, maxval=3.0)
    out2 = jax.block_until_ready(speed_encoder(speed2, w1, b1, w2, b2, SPEED_NORM))
    ref2 = reference(speed2, w1, b1, w2, b2, SPEED_NORM)
    assert out2.shape == (B2, C)
    assert jnp.allclose(out2, ref2, atol=1e-4, rtol=1e-4), "mismatch vs reference (B=1024)"

    print("KERNEL_OK")
</pallas_src>

<mosaic_0001>
module attributes {stable_mosaic.version = 11 : i64} {
  func.func @_folded_kernel(%arg0: i32, %arg1: memref<8x8xf32, #tpu.memory_space<vmem>>, %arg2: memref<10x128xf32, #tpu.memory_space<vmem>>, %arg3: memref<128x128xf32, #tpu.memory_space<vmem>>, %arg4: memref<8x128xf32, #tpu.memory_space<vmem>>) attributes {dimension_semantics = [#tpu.dimension_semantics<parallel>], iteration_bounds = array<i64: 1>, scalar_prefetch = 0 : i64, scratch_operands = 0 : i64, tpu.core_type = #tpu.core_type<tc>, window_params = [{transform_indices = @transform_0, window_bounds = array<i64: 8, 8>}, {pipeline_mode = #tpu.pipeline_mode<synchronous>, transform_indices = @transform_1, window_bounds = array<i64: 10, 128>}, {pipeline_mode = #tpu.pipeline_mode<synchronous>, transform_indices = @transform_2, window_bounds = array<i64: 128, 128>}, {transform_indices = @transform_3, window_bounds = array<i64: 8, 128>}]} {
    %c0 = arith.constant 0 : index
    %c0_0 = arith.constant 0 : index
    %0 = vector.load %arg1[%c0, %c0_0] : memref<8x8xf32, #tpu.memory_space<vmem>>, vector<8x8xf32>
    %cst = arith.constant 2.000000e-01 : f32
    %1 = vector.broadcast %cst : f32 to vector<8x8xf32>
    %2 = arith.mulf %0, %1 : vector<8x8xf32>
    %c0_1 = arith.constant 0 : index
    %c0_2 = arith.constant 0 : index
    %3 = vector.load %arg2[%c0_1, %c0_2] : memref<10x128xf32, #tpu.memory_space<vmem>>, vector<8x128xf32>
    %cst_3 = arith.constant dense<0.000000e+00> : vector<8x128xf32>
    %4 = tpu.matmul %2, %3, %cst_3 {dimension_numbers = #tpu.dot_dimension_numbers<[1], [0], [0], [1], [0, 0, 1, 1], [], []>} : vector<8x8xf32>, vector<8x128xf32>, vector<8x128xf32> -> vector<8x128xf32>
    %c8 = arith.constant 8 : index
    %c0_4 = arith.constant 0 : index
    %5 = vector.load %arg2[%c8, %c0_4] : memref<10x128xf32, #tpu.memory_space<vmem>>, vector<1x128xf32>
    %6 = vector.broadcast %5 : vector<1x128xf32> to vector<8x128xf32>
    %7 = arith.addf %4, %6 : vector<8x128xf32>
    %cst_5 = arith.constant 0.000000e+00 : f32
    %8 = vector.broadcast %cst_5 : f32 to vector<8x128xf32>
    %9 = arith.maximumf %7, %8 : vector<8x128xf32>
    %c0_6 = arith.constant 0 : index
    %c0_7 = arith.constant 0 : index
    %10 = vector.load %arg3[%c0_6, %c0_7] : memref<128x128xf32, #tpu.memory_space<vmem>>, vector<128x128xf32>
    %cst_8 = arith.constant dense<0.000000e+00> : vector<8x128xf32>
    %11 = tpu.matmul %9, %10, %cst_8 {dimension_numbers = #tpu.dot_dimension_numbers<[1], [0], [0], [1], [0, 0, 1, 1], [], []>} : vector<8x128xf32>, vector<128x128xf32>, vector<8x128xf32> -> vector<8x128xf32>
    %c9 = arith.constant 9 : index
    %c0_9 = arith.constant 0 : index
    %12 = vector.load %arg2[%c9, %c0_9] : memref<10x128xf32, #tpu.memory_space<vmem>>, vector<1x128xf32>
    %13 = vector.broadcast %12 : vector<1x128xf32> to vector<8x128xf32>
    %14 = arith.addf %11, %13 : vector<8x128xf32>
    %cst_10 = arith.constant 0.000000e+00 : f32
    %15 = vector.broadcast %cst_10 : f32 to vector<8x128xf32>
    %16 = arith.maximumf %14, %15 : vector<8x128xf32>
    %c0_11 = arith.constant 0 : index
    %c0_12 = arith.constant 0 : index
    %17 = vector.load %arg4[%c0_11, %c0_12] : memref<8x128xf32, #tpu.memory_space<vmem>>, vector<8x128xf32>
    tpu.vector_store %arg4[%c0_11, %c0_12], %16 {strides = array<i32>} : memref<8x128xf32, #tpu.memory_space<vmem>>, vector<8x128xf32>,
    return
  }
  func.func @transform_0(%arg0: i32) -> (i32, i32) {
    %c0_i32 = arith.constant 0 : i32
    %c0_i32_0 = arith.constant 0 : i32
    return %arg0, %c0_i32 : i32, i32
  }
  func.func @transform_1(%arg0: i32) -> (i32, i32) {
    %c0_i32 = arith.constant 0 : i32
    %c0_i32_0 = arith.constant 0 : i32
    %c0_i32_1 = arith.constant 0 : i32
    return %c0_i32, %c0_i32_0 : i32, i32
  }
  func.func @transform_2(%arg0: i32) -> (i32, i32) {
    %c0_i32 = arith.constant 0 : i32
    %c0_i32_0 = arith.constant 0 : i32
    %c0_i32_1 = arith.constant 0 : i32
    return %c0_i32, %c0_i32_0 : i32, i32
  }
  func.func @transform_3(%arg0: i32) -> (i32, i32) {
    %c0_i32 = arith.constant 0 : i32
    %c0_i32_0 = arith.constant 0 : i32
    return %arg0, %c0_i32 : i32, i32
  }
}

</mosaic_0001>

<bundles_post_ra>
// kernel: tpu_custom_call.1
= control target key start
LH: loop header
LB: loop body
LE: loop exit
PB: predicated region body
PF: predicated region fallthrough
CT: control target
= control target key end

     0   :  { %8 = vsyncpa [#allocation3], 0  ;;  %s518_s0 = inlined_call_operand.hbm [shape: f32[8,8], index: 0, kind: input, shape index: {}]   ;;  %s519_s1 = inlined_call_operand.hbm [shape: f32[10,128], index: 1, kind: input, shape index: {}]   ;;  %s520_s2 = inlined_call_operand.hbm [shape: f32[128,128], index: 2, kind: input, shape index: {}]   ;;  %s521_s3 = inlined_call_operand.hbm [shape: f32[8,128], index: 3, kind: output, shape index: {}]  }
   0x1   :  { %9 = vsyncpa [#allocation6], 0 }
   0x2   :  { %10 = vsyncpa [#allocation4], 0  ;;  %s435_s12 = smov [#allocation5]   ;;  %s341_s16 = scalar_lea.hbm %s519_s1, 256 }
   0x3   :  { %s26_s13 = sshll.u32 %s435_s12, 4  ;;  %p342_p0 = scmp.ne.s32.totalorder %s519_s1, %s341_s16  ;;  %s27_s13 = int_to_ptr.vmem [resolvable:$true] %s26_s13 }
   0x4   :  { %p345_p1 = scmp.lt.u32.totalorder %s341_s16, %s519_s1 }
   0x6   :  { %p347_p2 = pnand %p345_p1, %p342_p0 }
   0x8   :  { %350 = shalt.err (!%p347_p2)
}
   0x9   :  { %s351_s21 = scalar_lea.vmem %s27_s13, 256  ;;  %p356_p4 = scmp.lt.s32.totalorder %s27_s13, %s27_s13 }
   0xa   :  { %p352_p3 = scmp.ne.s32.totalorder %s27_s13, %s351_s21  ;;  %p357_p5 = scmp.lt.s32.totalorder %s351_s21, %s351_s21 }
   0xc   :  { %p358_p6 = por %p357_p5, %p356_p4 }
   0xe   :  { %p359_p7 = pnand %p358_p6, %p352_p3 }
  0x10   :  { %362 = shalt.err (!%p359_p7)
}
  0x11   :  { %s436_s22 = smov 128   ;;  %s437_s23 = smov 8  }
  0x12   :  { %32 = dma.hbm_to_vmem [thread:$0]  %s519_s1, 256, %s27_s13, [#allocation6], %s436_s22, %s436_s22, %s437_s23  }
  0x13   :  { %s438_s26 = smov [#allocation2]   ;;  %s439_s28 = smov [#allocation7]  }
  0x14   :  { %s17_s27 = sshll.u32 %s438_s26, 4  ;;  %s38_s29 = sshll.u32 %s439_s28, 4  ;;  %s18_s27 = int_to_ptr.vmem [resolvable:$true] %s17_s27  ;;  %s39_s29 = int_to_ptr.vmem [resolvable:$true] %s38_s29 }
  0x15   :  { %s363_s5 = scalar_lea.hbm %s518_s0, 128 }
  0x16   :  { %p364_p8 = scmp.ne.s32.totalorder %s518_s0, %s363_s5  ;;  %p367_p9 = scmp.lt.u32.totalorder %s363_s5, %s518_s0 }
  0x18   :  { %p369_p10 = pnand %p367_p9, %p364_p8 }
  0x1a   :  { %372 = shalt.err (!%p369_p10)
}
  0x1b   :  { %s373_s1 = scalar_lea.vmem %s18_s27, 128  ;;  %p378_p12 = scmp.lt.s32.totalorder %s18_s27, %s18_s27 }
  0x1c   :  { %p374_p11 = scmp.ne.s32.totalorder %s18_s27, %s373_s1  ;;  %p379_p13 = scmp.lt.s32.totalorder %s373_s1, %s373_s1 }
  0x1e   :  { %p380_p0 = por %p379_p13, %p378_p12 }
  0x20   :  { %p381_p1 = pnand %p380_p0, %p374_p11 }
  0x22   :  { %384 = shalt.err (!%p381_p1)
}
  0x23   :  { %20 = dma.hbm_to_vmem [thread:$0]  %s518_s0, 128, %s18_s27, [#allocation3]  }
  0x24   :  { %s385_s14 = scalar_lea.hbm %s520_s2, 2048 }
  0x25   :  { %p386_p2 = scmp.ne.s32.totalorder %s520_s2, %s385_s14  ;;  %p389_p3 = scmp.lt.u32.totalorder %s385_s14, %s520_s2 }
  0x27   :  { %p391_p4 = pnand %p389_p3, %p386_p2 }
  0x29   :  { %394 = shalt.err (!%p391_p4)
}
  0x2a   :  { %s395_s19 = scalar_lea.vmem %s39_s29, 2048  ;;  %p400_p6 = scmp.lt.s32.totalorder %s39_s29, %s39_s29 }
  0x2b   :  { %p396_p5 = scmp.ne.s32.totalorder %s39_s29, %s395_s19  ;;  %p401_p7 = scmp.lt.s32.totalorder %s395_s19, %s395_s19 }
  0x2d   :  { %p402_p8 = por %p401_p7, %p400_p6 }
  0x2f   :  { %p403_p9 = pnand %p402_p8, %p396_p5 }
  0x31   :  { %406 = shalt.err (!%p403_p9)
}
  0x32   :  { %44 = dma.hbm_to_vmem [thread:$0]  %s520_s2, 2048, %s39_s29, [#allocation6], %s436_s22, %s436_s22, %s437_s23  }
  0x33   :  { %429 = dma.done.wait [#allocation3], 128  }
  0x34   :  { %430 = vsyncadd [#allocation3], 4294967168 }
  0x35   :  { %431 = dma.done.wait [#allocation6], 2304  }
  0x36   :  { %432 = vsyncadd [#allocation6], 4294964992  ;;  %v440_v0 = vmov 0.0   ;;  %vm441_vm0 = vmmov 0   ;;  %v442_v1 = vmov 0.0|0.0   ;;  %v56_v2 = vld [vmem:[#allocation5] sm:$0xff] }
  0x37   :  { %268 = vmatprep.subr.mxu0 %v440_v0  ;;  %270 = vmatprep.mubr.msk.f32.mxu0 %vm441_vm0, %v440_v0  ;;  %v54_v3 = vld [vmem:[#allocation2] sm:$0xff]  ;;  %vm62_vm1 = vcmask 64512   ;;  %v137_v4 = vld [vmem:[#allocation7] sm:$0xff]  ;;  %v139_v7 = vld [vmem:[#allocation7 + $0x10] sm:$0xff]  ;;  %s443_s2 = smov [#allocation8]  }
  0x38   :  { %308 = vmatprep.subr.bf16.mxu1 %v442_v1  ;;  %305 = vmatprep.mubr.msk.f32.mxu1 %vm441_vm0, %v440_v0  ;;  %v55_v5 = vmul.f32 0.2, %v54_v3  ;;  %v138_v6 = vld [vmem:[#allocation7 + $0x8] sm:$0xff]  ;;  %v140_v8 = vld [vmem:[#allocation7 + $0x18] sm:$0xff]  ;;  %v141_v11 = vld [vmem:[#allocation7 + $0x20] sm:$0xff]  ;;  %s236_s21 = sshll.u32 %s443_s2, 4  ;;  %s237_s21 = int_to_ptr.vmem [resolvable:$true] %s236_s21 }
  0x39   :  { %269 = vmatpush3.msra.mxu0 %v56_v2  ;;  %v309_v9 = vpack.c.bf16 %v138_v6, %v137_v4  ;;  %v312_v10 = vpack.c.bf16 %v140_v8, %v139_v7  ;;  %v142_v12 = vld [vmem:[#allocation7 + $0x28] sm:$0xff]  ;;  %v143_v14 = vld [vmem:[#allocation7 + $0x30] sm:$0xff]  ;;  %v144_v15 = vld [vmem:[#allocation7 + $0x38] sm:$0xff]  ;;  %s407_s22 = scalar_lea.vmem %s237_s21, 128  ;;  %p412_p11 = scmp.lt.s32.totalorder %s237_s21, %s237_s21 }
  0x3a   :  { %271 = vmatmul.mubr.msk.f32.vlgmr.msra.gmra.mrb[0].mxu0 %vm62_vm1, %v55_v5  ;;  %v315_v13 = vpack.c.bf16 %v142_v12, %v141_v11  ;;  %v318_v16 = vpack.c.bf16 %v144_v15, %v143_v14  ;;  %v145_v17 = vld [vmem:[#allocation7 + $0x40] sm:$0xff]  ;;  %v146_v18 = vld [vmem:[#allocation7 + $0x48] sm:$0xff]  ;;  %v147_v20 = vld [vmem:[#allocation7 + $0x50] sm:$0xff]  ;;  %p408_p10 = scmp.ne.s32.totalorder %s237_s21, %s407_s22  ;;  %p413_p12 = scmp.lt.s32.totalorder %s407_s22, %s407_s22 }
  0x3b   :  { %310 = vmatpush3.bf16.msra.mxu1 %v309_v9  ;;  %v321_v19 = vpack.c.bf16 %v146_v18, %v145_v17  ;;  %v148_v21 = vld [vmem:[#allocation7 + $0x58] sm:$0xff]  ;;  %v149_v23 = vld [vmem:[#allocation7 + $0x60] sm:$0xff]  ;;  %v150_v24 = vld [vmem:[#allocation7 + $0x68] sm:$0xff] }
  0x3c   :  { %311 = vmatprep.subr.bf16.mxu1 %v442_v1  ;;  %v324_v22 = vpack.c.bf16 %v148_v21, %v147_v20  ;;  %v327_v25 = vpack.c.bf16 %v150_v24, %v149_v23  ;;  %v151_v26 = vld [vmem:[#allocation7 + $0x70] sm:$0xff]  ;;  %v152_v27 = vld [vmem:[#allocation7 + $0x78] sm:$0xff]  ;;  %p414_p13 = por %p413_p12, %p412_p11 }
  0x3d   :  { %v330_v28 = vpack.c.bf16 %v152_v27, %v151_v26  ;;  %v246_v29 = vld [vmem:[#allocation5 + $0x8] ss:$0 sm:$0xff]  ;;  %v248_v34 = vld [vmem:[#allocation5 + $0x9] ss:$0 sm:$0xff] }
  0x3e   :  { %p415_p0 = pnand %p414_p13, %p408_p10 }
  0x3f   :  { %313 = vmatpush3.bf16.msra.mxu1 %v312_v10 }
  0x40   :  { %314 = vmatprep.subr.bf16.mxu1 %v442_v1 }
  0x43   :  { %316 = vmatpush3.bf16.msra.mxu1 %v315_v13 }
  0x44   :  { %317 = vmatprep.subr.bf16.mxu1 %v442_v1 }
  0x47   :  { %319 = vmatpush3.bf16.msra.mxu1 %v318_v16 }
  0x48   :  { %320 = vmatprep.subr.bf16.mxu1 %v442_v1 }
  0x4b   :  { %322 = vmatpush3.bf16.msra.mxu1 %v321_v19 }
  0x4c   :  { %323 = vmatprep.subr.bf16.mxu1 %v442_v1 }
  0x4f   :  { %325 = vmatpush3.bf16.msra.mxu1 %v324_v22 }
  0x50   :  { %326 = vmatprep.subr.bf16.mxu1 %v442_v1 }
  0x53   :  { %328 = vmatpush3.bf16.msra.mxu1 %v327_v25 }
  0x54   :  { %329 = vmatprep.subr.bf16.mxu1 %v442_v1 }
  0x57   :  { %331 = vmatpush3.bf16.msra.mxu1 %v330_v28 }
 0x10d   :  { %v132_v30 = vpop.f32.mrb[0].mxu0 }
 0x10e   :  { %v133_v31 = vadd.f32 %v246_v29, %v132_v30  ;;  %v272_v32 = vpop.f32.mrb[1].mxu0 }
 0x110   :  { %v136_v33 = vmax.f32 %v133_v31, 0.0 }
 0x112   :  { %306 = vmatmul.mubr.f32.vlgmr.msra.gmra.mrb[0].mxu1 %v136_v33 }
 0x1e5   :  { %v224_v35 = vpop.f32.mrb[0].mxu1 }
 0x1e6   :  { %v225_v36 = vadd.f32 %v248_v34, %v224_v35  ;;  %v307_v37 = vpop.f32.mrb[1].mxu1 }
 0x1e8   :  { %v228_v38 = vmax.f32 %v225_v36, 0.0 }
 0x1ea   :  { %229 = vst [vmem:[#allocation8] sm:$0xff] %v228_v38 }
 0x1eb   :  { %418 = shalt.err (!%p415_p0)
}
 0x1ec   :  { %s419_s25 = scalar_lea.hbm %s521_s3, 128 }
 0x1ed   :  { %p420_p1 = scmp.ne.s32.totalorder %s521_s3, %s419_s25  ;;  %p423_p2 = scmp.lt.u32.totalorder %s419_s25, %s521_s3 }
 0x1ef   :  { %p425_p3 = pnand %p423_p2, %p420_p1 }
 0x1f1   :  { %428 = shalt.err (!%p425_p3)
}
 0x1f2   :  { %239 = dma.vmem_to_hbm [thread:$0]  %s237_s21, 128, %s521_s3, [#allocation4]  }
 0x1f3   :  { %433 = dma.done.wait [#allocation4], 128  }
 0x1f4   :  { %434 = vsyncadd [#allocation4], 4294967168 }
 0x1f5   :  { %243 = vsyncpa [#allocation3], 1 }
 0x1f6   :  { %244 = vsyncpa [#allocation6], 1 }
 0x1f7   :  { %245 = vsyncpa [#allocation4], 1 }

</bundles_post_ra>
